<compile_context>
chip_gen: v5e
topology: v5e:2x2
jax: 0.10.0
libtpu: 0.0.40
codegen_flags: <defaults>
</compile_context>

<pallas_src>
import functools
import math

import jax
import jax.numpy as jnp
import numpy as np
from jax.experimental import pallas as pl
from jax.experimental.pallas import tpu as pltpu


def _cdiv(a, b):
    return -(-a // b)


def _round_up(a, m):
    return _cdiv(a, m) * m


def _aa_kernel(x_ref, bh_ref, bw_ref, o_ref, y_ref, *, tbc, H):
    """Fused blur + nearest downsample for one block of `tbc` planes.

    x_ref : (tbc*H, W)           input planes stacked along rows
    bh_ref: (H_out, H)           banded vertical Gaussian taps
    bw_ref: (W, W_out)           banded horizontal Gaussian taps
    o_ref : (tbc, H_out, W_out)  output planes
    y_ref : (tbc*H, W_out)       VMEM scratch holding the W-contracted image
    """
    # Stage 1: contract W for all planes at once (planes folded into the MXU M
    # dimension).  Native-dtype operands, f32 accumulation.
    y_ref[...] = jnp.dot(
        x_ref[...], bw_ref[...], preferred_element_type=jnp.float32
    ).astype(y_ref.dtype)

    bh = bh_ref[...]

    # Stage 2: contract H per plane (small matmul, ~1/4 of total FLOPs).
    def body(b, carry):
        yb = y_ref[pl.ds(b * H, H), :]                        # (H, W_out)
        o_ref[b] = jnp.dot(
            bh, yb, preferred_element_type=jnp.float32
        ).astype(o_ref.dtype)
        return carry

    jax.lax.fori_loop(0, tbc, body, 0, unroll=(tbc <= 8))


def anti_alias_interpolation2d(x, scale=0.25, *, planes_per_block=None):
    """JAX/Pallas port of AntiAliasInterpolation2d.forward (NCHW input)."""
    if scale == 1.0:
        # Identity fast path (sigma would be 0 -> degenerate Gaussian).
        return x

    B, C, H, W = x.shape
    H_out = int(math.floor(H * scale))
    W_out = int(math.floor(W * scale))
    if H_out < 1 or W_out < 1:
        raise ValueError(f"scale={scale} collapses spatial dims ({H},{W}) to zero")

    dtype = x.dtype
    itemsize = jnp.dtype(dtype).itemsize

    # ---- Gaussian taps (matches the PyTorch __init__; K odd -> ka == kb) ----
    sigma = (1.0 / scale - 1.0) / 2.0
    K = 2 * round(sigma * 4) + 1
    ka = K // 2
    grid1d = np.arange(K, dtype=np.float64)
    mean = (K - 1) / 2.0
    g = np.exp(-((grid1d - mean) ** 2) / (2.0 * sigma ** 2))
    g = g / g.sum()

    # ---- nearest-neighbour source indices (exact integer arithmetic,
    #      matches F.interpolate(mode='nearest', recompute_scale_factor=True)).
    h_idx = np.minimum((np.arange(H_out) * H) // H_out, H - 1)
    w_idx = np.minimum((np.arange(W_out) * W) // W_out, W - 1)

    # ---- banded matrices: blur taps at the sampled rows/cols; zero padding is
    #      folded in by dropping out-of-range taps.
    def banded(idx, n_in):
        off = np.arange(n_in)[None, :] - idx[:, None] + ka
        valid = (off >= 0) & (off < K)
        return np.where(valid, g[np.clip(off, 0, K - 1)], 0.0)

    bh = jnp.asarray(banded(h_idx, H), dtype=dtype)           # (H_out, H)
    bw = jnp.asarray(banded(w_idx, W).T, dtype=dtype)         # (W, W_out)

    # ---- per-generation VMEM budget & planes-per-block selection ------------
    BC = B * C
    Hp, Wp = _round_up(H, 8), _round_up(W, 128)
    Hop, Wop = _round_up(H_out, 8), _round_up(W_out, 128)
    in_plane = Hp * Wp * itemsize                 # (8,128)-padded footprint
    out_plane = Hop * Wop * itemsize
    y_plane = Hp * Wop * itemsize                 # stage-1 scratch per plane
    per_plane = 2 * in_plane + 2 * out_plane + y_plane   # in/out double-buffered
    const_bytes = 2 * itemsize * (
        _round_up(H_out, 8) * _round_up(H, 128)
        + _round_up(W, 8) * _round_up(W_out, 128))

    try:
        vmem_cap = int(pltpu.get_tpu_info().vmem_capacity_bytes)
    except Exception:                              # conservative fallback (v7x)
        vmem_cap = 64 * 1024 * 1024
    vmem_limit = min(vmem_cap // 2, 48 * 1024 * 1024)   # ~32 MiB v7x, 48 MiB v5e/v6e
    data_budget = max(vmem_limit * 3 // 4 - const_bytes, per_plane)

    if planes_per_block is None:
        tbc = max(1, data_budget // per_plane)
        # Keep >=4 grid steps so the BlockSpec pipeline overlaps DMA with
        # compute, and >=2 steps so both v7x TensorCores get work.
        tbc = min(tbc, _cdiv(BC, min(BC, 4)))
    else:
        tbc = int(planes_per_block)
    tbc = max(1, min(tbc, BC))
    # x is tiled as (tbc*H, W) blocks: tbc*H must be a multiple of 8.
    align = 8 // math.gcd(H, 8)
    tbc = max(align, (tbc // align) * align)

    nblk = _cdiv(BC, tbc)
    BCp = nblk * tbc

    # Final VMEM limit: enough for the chosen tile + headroom, capped at 7/8 cap.
    vmem_limit = int(min(max(vmem_limit, tbc * per_plane + const_bytes + (4 << 20)),
                         vmem_cap * 7 // 8))

    xf = x.reshape(BC, H, W)
    if BCp != BC:
        xf = jnp.pad(xf, ((0, BCp - BC), (0, 0), (0, 0)))
    x2d = xf.reshape(BCp * H, W)                  # planes stacked along rows

    out = pl.pallas_call(
        functools.partial(_aa_kernel, tbc=tbc, H=H),
        out_shape=jax.ShapeDtypeStruct((BCp, H_out, W_out), dtype),
        grid=(nblk,),
        in_specs=[
            pl.BlockSpec((tbc * H, W), lambda i: (i, 0)),
            pl.BlockSpec((H_out, H), lambda i: (0, 0)),   # resident across steps
            pl.BlockSpec((W, W_out), lambda i: (0, 0)),   # resident across steps
        ],
        out_specs=pl.BlockSpec((tbc, H_out, W_out), lambda i: (i, 0, 0)),
        scratch_shapes=[pltpu.VMEM((tbc * H, W_out), dtype)],
        compiler_params=pltpu.CompilerParams(
            dimension_semantics=("parallel",),
            vmem_limit_bytes=vmem_limit,
        ),
    )(x2d, bh, bw)

    # TODO(synk): a lane-dense (BCp, H_out*W_out) output layout would avoid
    # masked stores when W_out < 128; skipped because the in-kernel minor-dim
    # reshape costs an XLU relayout and output traffic is ~1/16 of input here.
    return out[:BC].reshape(B, C, H_out, W_out)


def _reference(x, scale=0.25):
    """Pure-JAX reference mirroring the PyTorch module (for validation)."""
    B, C, H, W = x.shape
    sigma = (1.0 / scale - 1.0) / 2.0
    K = 2 * round(sigma * 4) + 1
    ka = K // 2
    kb = ka - 1 if K % 2 == 0 else ka

    grid1d = jnp.arange(K, dtype=jnp.float32)
    mean = (K - 1) / 2.0
    k1 = jnp.exp(-((grid1d - mean) ** 2) / (2.0 * sigma ** 2))
    k2d = k1[:, None] * k1[None, :]
    k2d = k2d / jnp.sum(k2d)
    weight = jnp.tile(k2d[None, None], (C, 1, 1, 1))          # (C,1,K,K)

    xp = jnp.pad(x, ((0, 0), (0, 0), (ka, kb), (ka, kb)))
    conv = jax.lax.conv_general_dilated(
        xp, weight, window_strides=(1, 1), padding="VALID",
        feature_group_count=C, dimension_numbers=("NCHW", "OIHW", "NCHW"),
        precision=jax.lax.Precision.HIGHEST)

    H_out = int(math.floor(H * scale))
    W_out = int(math.floor(W * scale))
    h_idx = jnp.asarray(np.minimum((np.arange(H_out) * H) // H_out, H - 1))
    w_idx = jnp.asarray(np.minimum((np.arange(W_out) * W) // W_out, W - 1))
    return conv[:, :, h_idx, :][:, :, :, w_idx]


if __name__ == "__main__":
    key = jax.random.PRNGKey(0)
    B, C, H, W = 2, 4, 16, 16
    scale = 0.25
    x = jax.random.normal(key, (B, C, H, W), dtype=jnp.float32)

    out = jax.block_until_ready(anti_alias_interpolation2d(x, scale=scale))
    ref = jax.block_until_ready(_reference(x, scale=scale))

    assert out.shape == (B, C, int(H * scale), int(W * scale)), out.shape
    max_err = float(jnp.max(jnp.abs(out - ref)))
    assert jnp.allclose(out, ref, atol=5e-3, rtol=5e-3), max_err

    print("KERNEL_OK")
</pallas_src>

<mosaic_0001>
module attributes {stable_mosaic.version = 11 : i64} {
  func.func @_aa_kernel(%arg0: i32, %arg1: memref<32x16xf32, #tpu.memory_space<vmem>>, %arg2: memref<4x16xf32, #tpu.memory_space<vmem>>, %arg3: memref<16x4xf32, #tpu.memory_space<vmem>>, %arg4: memref<2x4x4xf32, #tpu.memory_space<vmem>>, %arg5: memref<32x4xf32, #tpu.memory_space<vmem>>) attributes {dimension_semantics = [#tpu.dimension_semantics<parallel>], iteration_bounds = array<i64: 4>, scalar_prefetch = 0 : i64, scratch_operands = 1 : i64, tpu.core_type = #tpu.core_type<tc>, window_params = [{transform_indices = @transform_0, window_bounds = array<i64: 32, 16>}, {pipeline_mode = #tpu.pipeline_mode<synchronous>, transform_indices = @transform_1, window_bounds = array<i64: 4, 16>}, {pipeline_mode = #tpu.pipeline_mode<synchronous>, transform_indices = @transform_2, window_bounds = array<i64: 16, 4>}, {transform_indices = @transform_3, window_bounds = array<i64: 2, 4, 4>}]} {
    %c0 = arith.constant 0 : index
    %c0_0 = arith.constant 0 : index
    %0 = vector.load %arg1[%c0, %c0_0] : memref<32x16xf32, #tpu.memory_space<vmem>>, vector<32x16xf32>
    %c0_1 = arith.constant 0 : index
    %c0_2 = arith.constant 0 : index
    %1 = vector.load %arg3[%c0_1, %c0_2] : memref<16x4xf32, #tpu.memory_space<vmem>>, vector<16x4xf32>
    %cst = arith.constant dense<0.000000e+00> : vector<32x4xf32>
    %2 = tpu.matmul %0, %1, %cst {dimension_numbers = #tpu.dot_dimension_numbers<[1], [0], [0], [1], [0, 0, 1, 1], [], []>} : vector<32x16xf32>, vector<16x4xf32>, vector<32x4xf32> -> vector<32x4xf32>
    %c0_3 = arith.constant 0 : index
    %c0_4 = arith.constant 0 : index
    %3 = vector.load %arg5[%c0_3, %c0_4] : memref<32x4xf32, #tpu.memory_space<vmem>>, vector<32x4xf32>
    tpu.vector_store %arg5[%c0_3, %c0_4], %2 {strides = array<i32>} : memref<32x4xf32, #tpu.memory_space<vmem>>, vector<32x4xf32>,
    %c0_5 = arith.constant 0 : index
    %c0_6 = arith.constant 0 : index
    %4 = vector.load %arg2[%c0_5, %c0_6] : memref<4x16xf32, #tpu.memory_space<vmem>>, vector<4x16xf32>
    %c0_i32 = arith.constant 0 : i32
    %c16_i32 = arith.constant 16 : i32
    %5 = arith.muli %c0_i32, %c16_i32 : i32
    %6 = arith.index_cast %5 : i32 to index
    %c0_7 = arith.constant 0 : index
    %7 = vector.load %arg5[%6, %c0_7] : memref<32x4xf32, #tpu.memory_space<vmem>>, vector<16x4xf32>
    %cst_8 = arith.constant dense<0.000000e+00> : vector<4x4xf32>
    %8 = tpu.matmul %4, %7, %cst_8 {dimension_numbers = #tpu.dot_dimension_numbers<[1], [0], [0], [1], [0, 0, 1, 1], [], []>} : vector<4x16xf32>, vector<16x4xf32>, vector<4x4xf32> -> vector<4x4xf32>
    %9 = arith.index_cast %c0_i32 : i32 to index
    %c0_9 = arith.constant 0 : index
    %c0_10 = arith.constant 0 : index
    %10 = vector.load %arg4[%9, %c0_9, %c0_10] : memref<2x4x4xf32, #tpu.memory_space<vmem>>, vector<1x4x4xf32>
    %11 = vector.shape_cast %10 : vector<1x4x4xf32> to vector<4x4xf32>
    %12 = vector.shape_cast %8 : vector<4x4xf32> to vector<1x4x4xf32>
    tpu.vector_store %arg4[%9, %c0_9, %c0_10], %12 {strides = array<i32>} : memref<2x4x4xf32, #tpu.memory_space<vmem>>, vector<1x4x4xf32>,
    %c1_i32 = arith.constant 1 : i32
    %c16_i32_11 = arith.constant 16 : i32
    %13 = arith.muli %c1_i32, %c16_i32_11 : i32
    %14 = arith.index_cast %13 : i32 to index
    %c0_12 = arith.constant 0 : index
    %15 = vector.load %arg5[%14, %c0_12] : memref<32x4xf32, #tpu.memory_space<vmem>>, vector<16x4xf32>
    %cst_13 = arith.constant dense<0.000000e+00> : vector<4x4xf32>
    %16 = tpu.matmul %4, %15, %cst_13 {dimension_numbers = #tpu.dot_dimension_numbers<[1], [0], [0], [1], [0, 0, 1, 1], [], []>} : vector<4x16xf32>, vector<16x4xf32>, vector<4x4xf32> -> vector<4x4xf32>
    %17 = arith.index_cast %c1_i32 : i32 to index
    %c0_14 = arith.constant 0 : index
    %c0_15 = arith.constant 0 : index
    %18 = vector.load %arg4[%17, %c0_14, %c0_15] : memref<2x4x4xf32, #tpu.memory_space<vmem>>, vector<1x4x4xf32>
    %19 = vector.shape_cast %18 : vector<1x4x4xf32> to vector<4x4xf32>
    %20 = vector.shape_cast %16 : vector<4x4xf32> to vector<1x4x4xf32>
    tpu.vector_store %arg4[%17, %c0_14, %c0_15], %20 {strides = array<i32>} : memref<2x4x4xf32, #tpu.memory_space<vmem>>, vector<1x4x4xf32>,
    %c2_i32 = arith.constant 2 : i32
    return
  }
  func.func @transform_0(%arg0: i32) -> (i32, i32) {
    %c0_i32 = arith.constant 0 : i32
    %c0_i32_0 = arith.constant 0 : i32
    return %arg0, %c0_i32 : i32, i32
  }
  func.func @transform_1(%arg0: i32) -> (i32, i32) {
    %c0_i32 = arith.constant 0 : i32
    %c0_i32_0 = arith.constant 0 : i32
    %c0_i32_1 = arith.constant 0 : i32
    return %c0_i32, %c0_i32_0 : i32, i32
  }
  func.func @transform_2(%arg0: i32) -> (i32, i32) {
    %c0_i32 = arith.constant 0 : i32
    %c0_i32_0 = arith.constant 0 : i32
    %c0_i32_1 = arith.constant 0 : i32
    return %c0_i32, %c0_i32_0 : i32, i32
  }
  func.func @transform_3(%arg0: i32) -> (i32, i32, i32) {
    %c0_i32 = arith.constant 0 : i32
    %c0_i32_0 = arith.constant 0 : i32
    %c0_i32_1 = arith.constant 0 : i32
    return %arg0, %c0_i32, %c0_i32_0 : i32, i32, i32
  }
}

</mosaic_0001>

<bundles_post_ra>
// kernel: tpu_custom_call.1
= control target key start
LH: loop header
LB: loop body
LE: loop exit
PB: predicated region body
PF: predicated region fallthrough
CT: control target
= control target key end

     0   :  { %s391_s12 = smov 0   ;;  %s427_s0 = inlined_call_operand.vmem [shape: f32[128,16], index: 0, kind: input, shape index: {}]   ;;  %s428_s1 = inlined_call_operand.vmem [shape: f32[4,16], index: 1, kind: input, shape index: {}]   ;;  %s429_s2 = inlined_call_operand.vmem [shape: f32[16,4], index: 2, kind: input, shape index: {}]   ;;  %s430_s3 = inlined_call_operand.vmem [shape: f32[8,4,4], index: 3, kind: output, shape index: {}]  }
   0x1 LB: > { %s335_s13 = sadd.s32 4294967295, %s369_s12   ;;  %p339_p0 = scmp.ge.s32.totalorder %s369_s12, 1  ;;  %s369_s12 = sphi %s391_s12, %s13_s12  }
   0x2   : > { %p138_p1 = scmp.lt.s32.totalorder %s369_s12, 5 }
   0x4   : > { %p139_p2 = pnand %p339_p0, %p138_p1 }
   0x5   : > { %s340_s18 = sshll.u32 (!%p139_p2), %s335_s13, 2  ;;  %s342_s25 = sshll.u32 (!%p139_p2), %s335_s13, 1 }
   0x6   : > { %142 = sbr.rel (%p139_p2) target bundleno = 299 (0x12b), region = 32  ;;  %p163_p3 = scmp.lt.s32.totalorder (!%p139_p2), %s340_s18, 15 }
   0x7   : > { %p169_p4 = scmp.lt.s32.totalorder (!%p139_p2), %s342_s25, 7 }
   0xb   : > { %v179_v0 = vld [vmem:[%s429_s2 + $0x8] sm:$0xff]  ;;  %v178_v1 = vld [vmem:[%s429_s2] sm:$0xff]  ;;  %s432_s18 = smov (!%p163_p3, %s340_s18), 15  ;;  %vm180_vm0 = vcmask 130048   ;;  %vm222_vm1 = vcmask 31744   ;;  %s434_s25 = smov (!%p169_p4, %s342_s25), 7 }
   0xc   : > { %353 = vmatpush.msra.mxu3 %v179_v0  ;;  %207 = vmatpush.msra.mxu0 %v179_v0  ;;  %s341_s19 = sshll.u32 %s432_s18, 3  ;;  %v227_v12 = vld [vmem:[%s428_s1] sm:$0xf]  ;;  %s343_s26 = sshll.u32 %s434_s25, 2  ;;  %vm253_vm2 = vcmask 27648  }
   0xd   : > { %s166_s22 = scalar_lea.vmem %s427_s0, %s341_s19  ;;  %s172_s29 = scalar_lea.vmem %s430_s3, %s343_s26 }
   0xe   : > { %354 = vmatpush.msra.mxu3 %v178_v1  ;;  %208 = vmatpush.msra.mxu0 %v178_v1  ;;  %v176_v2 = vld [vmem:[%s166_s22 + $0x10] sm:$0xff]  ;;  %v174_v3 = vld [vmem:[%s166_s22] sm:$0xff]  ;;  %v177_v4 = vld [vmem:[%s166_s22 + $0x18] sm:$0xff] }
   0xf   : > { %346 = vmatmul.msk.f32.vlgmr.msra.gmra.mxu3 %vm180_vm0, %v176_v2  ;;  %344 = vmatmul.msk.f32.vlgmr.msra.gmra.mxu0 %vm180_vm0, %v174_v3  ;;  %v175_v5 = vld [vmem:[%s166_s22 + $0x8] sm:$0xff] }
  0x17   : > { %347 = vmatmul.msk.f32.gmra.mxu3 %vm180_vm0, %v177_v4  ;;  %345 = vmatmul.msk.f32.gmra.mxu0 %vm180_vm0, %v175_v5 }
  0x8c   : > { %v210_v6 = vpop.f32.mrf.mxu0 }
  0x8d   : > { %223 = vst.msk [vmem:[#allocation2] sm:$0xff] %vm222_vm1, %v210_v6 }
  0x92   : > { %v216_v7 = vpop.f32.mrf.mxu3 }
  0x93   : > { %225 = vst.msk [vmem:[#allocation2 + $0x10] sm:$0xff] %vm222_vm1, %v216_v7 }
  0x94   : > { %v213_v8 = vpop.f32.mrf.mxu0  ;;  %v228_v11 = vld [vmem:[#allocation2] sm:$0xff] }
  0x95   : > { %224 = vst.msk [vmem:[#allocation2 + $0x8] sm:$0xff] %vm222_vm1, %v213_v8 }
  0x9a   : > { %v219_v9 = vpop.f32.mrf.mxu3  ;;  %v255_v14 = vld [vmem:[#allocation2 + $0x10] sm:$0xff] }
  0x9b   : > { %226 = vst.msk [vmem:[#allocation2 + $0x18] sm:$0xff] %vm222_vm1, %v219_v9 }
  0x9c   : > { %v229_v10 = vld [vmem:[#allocation2 + $0x8] sm:$0xff] }
  0x9d   : > { %247 = vmatpush.msra.mxu1 %v229_v10 }
  0x9f   : > { %248 = vmatpush.msra.mxu1 %v228_v11 }
  0xa0   : > { %348 = vmatmul.msk.f32.vlgmr.msra.gmra.mxu1 %vm180_vm0, %v227_v12 }
  0xa2   : > { %v256_v13 = vld [vmem:[#allocation2 + $0x18] sm:$0xff] }
  0xa3   : > { %271 = vmatpush.msra.mxu2 %v256_v13 }
  0xa5   : > { %272 = vmatpush.msra.mxu2 %v255_v14 }
  0xa6   : > { %349 = vmatmul.msk.f32.vlgmr.msra.gmra.mxu2 %vm180_vm0, %v227_v12 }
 0x11d   : > { %v250_v15 = vpop.f32.mrf.mxu1 }
 0x11e   : > { %254 = vst.msk [vmem:[%s172_s29] sm:$0xf] %vm253_vm2, %v250_v15 }
 0x129   : > { %v274_v16 = vpop.f32.mrf.mxu2 }
 0x12a   : > { %350 = vst.msk [vmem:[%s172_s29 + $0x4] sm:$0xf] %vm253_vm2, %v274_v16 }
 0x12b PF: > { %s13_s12 = sadd.s32 1, %s369_s12  }
 0x12c   : > { %p10_p5 = scmp.ge.s32.totalorder %s13_s12, 6  }
 0x12e   :  { %12 = sbr.rel (!%p10_p5) target bundleno = 1 (0x1), region = 63 }

</bundles_post_ra>
